<compile_context>
chip_gen: v6e
topology: v6e:2x2x1
jax: 0.10.0
libtpu: 0.0.40
codegen_flags: <defaults>
</compile_context>

<pallas_src>
import functools

import jax
import jax.numpy as jnp
from jax.experimental import pallas as pl
from jax.experimental.pallas import tpu as pltpu


def _round_up(x, m):
    return (x + m - 1) // m * m


def ffnn_lm_kernel(idx_ref, tbl_ref, b1_ref, w2_ref, b2_ref, o_ref):
    """One batch tile: fused (embedding+fc1) gather, ReLU, fc2, log-softmax."""
    TB, C = idx_ref.shape            # batch tile, context length (n_gram - 1)
    _, V, H = tbl_ref.shape          # context, vocab, padded hidden

    idx = idx_ref[...]               # (TB, C) int32 token ids

    # fc1 accumulator starts at the bias (f32); broadcast hoisted out of loop.
    h = jnp.broadcast_to(b1_ref[...], (TB, H))

    # Embedding+fc1 fused: per context position, a one-hot row-select matmul
    # against the precomputed fused table T[c] = emb @ w1_c ((V, H), bf16).
    # One lane-dense MXU matmul per position, no x_emb intermediate.
    lane_ids = jax.lax.broadcasted_iota(jnp.int32, (TB, V), 1)
    for c in range(C):               # C = n_gram - 1 is tiny; static unroll
        onehot = (lane_ids == idx[:, c:c + 1]).astype(tbl_ref.dtype)   # (TB, V)
        h = h + jnp.dot(onehot, tbl_ref[c], preferred_element_type=jnp.float32)

    h = jnp.maximum(h, 0.0)                                            # ReLU, f32 VPU

    # fc2 on the bf16 MXU path with f32 accumulation; bias in f32.
    logits = jnp.dot(h.astype(w2_ref.dtype), w2_ref[...],
                     preferred_element_type=jnp.float32) + b2_ref[...]  # (TB, V)

    # Numerically stable LogSoftmax over the vocab axis (all f32).
    m = jnp.max(logits, axis=-1, keepdims=True)
    shifted = logits - m
    lse = jnp.log(jnp.sum(jnp.exp(shifted), axis=-1, keepdims=True))
    o_ref[...] = (shifted - lse).astype(o_ref.dtype)


def _pick_batch_tile(B, block_b):
    """Multiple-of-8 batch tile; >=2 grid tiles when B allows (v7x megacore)."""
    tb = min(block_b, _round_up(B, 8))
    if B >= 16 and _round_up(B, tb) // tb < 2:
        tb = _round_up((B + 1) // 2, 8)          # split into ~2 tiles
    return max(tb, 8)


@functools.partial(jax.jit, static_argnames=("block_b",))
def ffnn_lm_forward(x_idx, emb_table, w1, b1, w2, b2, *, block_b=128):
    """x_idx: (B, n_gram-1) int32 token ids. Returns (B, vocab) f32 log-probs."""
    B, C = x_idx.shape
    V, E = emb_table.shape
    in_dim, H = w1.shape
    assert in_dim == C * E, "fc1 input dim must equal (n_gram-1)*embed_size"

    # ---- parameter prep (constant-folded under jit for fixed params).
    # Fold the embedding into fc1: T[c] = emb_table @ w1[c*E:(c+1)*E], bf16,
    # hidden padded to 128 lanes so the gather matmul and the fc2 contraction
    # are lane-dense / MXU aligned (zero pads are exact).
    H_pad = _round_up(max(H, 128), 128)
    tbl = jnp.einsum("ve,ceh->cvh", emb_table, w1.reshape(C, E, H))      # (C, V, H) f32
    tbl = jnp.pad(tbl, ((0, 0), (0, 0), (0, H_pad - H))).astype(jnp.bfloat16)
    b1_f = jnp.pad(b1.reshape(1, H), ((0, 0), (0, H_pad - H))).astype(jnp.float32)
    w2_b = jnp.pad(w2, ((0, H_pad - H), (0, 0))).astype(jnp.bfloat16)
    b2_f = b2.reshape(1, V).astype(jnp.float32)

    # ---- batch tiling
    TB = _pick_batch_tile(B, block_b)
    B_pad = _round_up(B, TB)
    x_idx_p = jnp.pad(x_idx.astype(jnp.int32), ((0, B_pad - B), (0, 0)))

    resident = pl.Buffered(1)   # fetched once; double-buffering would waste VMEM

    out = pl.pallas_call(
        ffnn_lm_kernel,
        out_shape=jax.ShapeDtypeStruct((B_pad, V), jnp.float32),
        grid_spec=pltpu.PrefetchScalarGridSpec(
            num_scalar_prefetch=0,
            grid=(B_pad // TB,),
            in_specs=[
                pl.BlockSpec((TB, C), lambda i: (i, 0)),           # token ids (per tile)
                pl.BlockSpec((C, V, H_pad), lambda i: (0, 0, 0),   # fused emb@fc1 tables
                             pipeline_mode=resident),
                pl.BlockSpec((1, H_pad), lambda i: (0, 0),         # fc1 bias
                             pipeline_mode=resident),
                pl.BlockSpec((H_pad, V), lambda i: (0, 0),         # fc2 weight
                             pipeline_mode=resident),
                pl.BlockSpec((1, V), lambda i: (0, 0),             # fc2 bias
                             pipeline_mode=resident),
            ],
            out_specs=pl.BlockSpec((TB, V), lambda i: (i, 0)),     # lane-dense log-probs
        ),
        compiler_params=pltpu.CompilerParams(
            # batch tiles are independent -> shards across the 2 TCs on v7x,
            # neutral on v5e/v6e.
            dimension_semantics=("parallel",),
            # plenty at these shapes; raise toward ~96 MiB on v6e (128 MiB
            # physical) if running a large untiled vocab there.
            vmem_limit_bytes=32 * 1024 * 1024,
        ),
    )(x_idx_p, tbl, b1_f, w2_b, b2_f)

    # TODO(synk): for realistic vocab (>=4K): (a) replace the one-hot matmul
    # gather with an index-based gather (scalar-prefetched ids + row reads of
    # the VMEM-resident fused table) -- the one-hot path is O(TB*V) VALU work
    # and a (TB,V) iota footprint; (b) tile the vocab axis of w2/b2/out with a
    # two-pass online logsumexp (batch axis "parallel", vocab axis "arbitrary"
    # last) so w2 + the f32 logits fit v7x's 64 MiB VMEM.
    # TODO(synk): for large V, emit bf16 log-probs or fuse the downstream NLL
    # target-gather so the (B, V) f32 slab never round-trips HBM.
    return out[:B]


def _reference(x_idx, emb_table, w1, b1, w2, b2):
    """Pure-f32 reference matching the PyTorch module forward."""
    B = x_idx.shape[0]
    x = emb_table[x_idx].reshape(B, -1)
    h = jnp.maximum(x @ w1 + b1, 0.0)
    logits = h @ w2 + b2
    return jax.nn.log_softmax(logits, axis=1)


if __name__ == "__main__":
    # Small shapes consistent with the module.
    vocab_size = 128
    embed_size = 16
    hidden_size = 32
    n_gram = 4          # context of 3 previous tokens
    B = 8

    key = jax.random.PRNGKey(0)
    k_emb, k_w1, k_b1, k_w2, k_b2, k_x = jax.random.split(key, 6)

    in_dim = (n_gram - 1) * embed_size
    emb_table = jax.random.normal(k_emb, (vocab_size, embed_size), jnp.float32) * 0.1
    # PyTorch Linear stores (out, in); pre-transposed to (in, out) for x @ W.
    w1 = jax.random.normal(k_w1, (in_dim, hidden_size), jnp.float32) * 0.1
    b1 = jax.random.normal(k_b1, (hidden_size,), jnp.float32) * 0.1
    w2 = jax.random.normal(k_w2, (hidden_size, vocab_size), jnp.float32) * 0.1
    b2 = jax.random.normal(k_b2, (vocab_size,), jnp.float32) * 0.1

    x_idx = jax.random.randint(k_x, (B, n_gram - 1), 0, vocab_size, jnp.int32)

    out = ffnn_lm_forward(x_idx, emb_table, w1, b1, w2, b2)
    out = jax.block_until_ready(out)

    ref = _reference(x_idx, emb_table, w1, b1, w2, b2)
    assert out.shape == (B, vocab_size)
    # bf16 fused tables / fc2 with f32 accumulation -> bf16-level tolerance.
    max_err = float(jnp.max(jnp.abs(out - ref)))
    assert jnp.allclose(out, ref, atol=1e-2, rtol=1e-2), (
        f"mismatch vs reference, max abs err {max_err}")
    # Rows must be valid log-probability distributions.
    assert jnp.allclose(jnp.sum(jnp.exp(out), axis=1), 1.0, atol=1e-3)

    print("KERNEL_OK")
</pallas_src>

<mosaic_0001>
module attributes {stable_mosaic.version = 11 : i64} {
  func.func @ffnn_lm_kernel(%arg0: i32, %arg1: memref<8x3xi32, #tpu.memory_space<vmem>>, %arg2: memref<3x128x128xbf16, #tpu.memory_space<vmem>>, %arg3: memref<1x128xf32, #tpu.memory_space<vmem>>, %arg4: memref<128x128xbf16, #tpu.memory_space<vmem>>, %arg5: memref<1x128xf32, #tpu.memory_space<vmem>>, %arg6: memref<8x128xf32, #tpu.memory_space<vmem>>) attributes {dimension_semantics = [#tpu.dimension_semantics<parallel>], iteration_bounds = array<i64: 1>, scalar_prefetch = 0 : i64, scratch_operands = 0 : i64, tpu.core_type = #tpu.core_type<tc>, window_params = [{transform_indices = @transform_0, window_bounds = array<i64: 8, 3>}, {pipeline_mode = #tpu.pipeline_mode<synchronous>, transform_indices = @transform_1, window_bounds = array<i64: 3, 128, 128>}, {pipeline_mode = #tpu.pipeline_mode<synchronous>, transform_indices = @transform_2, window_bounds = array<i64: 1, 128>}, {pipeline_mode = #tpu.pipeline_mode<synchronous>, transform_indices = @transform_3, window_bounds = array<i64: 128, 128>}, {pipeline_mode = #tpu.pipeline_mode<synchronous>, transform_indices = @transform_4, window_bounds = array<i64: 1, 128>}, {transform_indices = @transform_5, window_bounds = array<i64: 8, 128>}]} {
    %c0 = arith.constant 0 : index
    %c0_0 = arith.constant 0 : index
    %0 = vector.load %arg1[%c0, %c0_0] : memref<8x3xi32, #tpu.memory_space<vmem>>, vector<8x3xi32>
    %c0_1 = arith.constant 0 : index
    %c0_2 = arith.constant 0 : index
    %1 = vector.load %arg3[%c0_1, %c0_2] : memref<1x128xf32, #tpu.memory_space<vmem>>, vector<1x128xf32>
    %2 = vector.shape_cast %1 : vector<1x128xf32> to vector<1x128xf32>
    %3 = vector.broadcast %2 : vector<1x128xf32> to vector<8x128xf32>
    %4 = tpu.iota {dimensions = array<i32: 1>} : vector<8x128xi32>
    %5 = vector.extract_strided_slice %0 {offsets = [0, 0], sizes = [8, 1], strides = [1, 1]} : vector<8x3xi32> to vector<8x1xi32>
    %6 = vector.broadcast %5 : vector<8x1xi32> to vector<8x128xi32>
    %7 = arith.cmpi eq, %4, %6 : vector<8x128xi32>
    %8 = arith.extui %7 : vector<8x128xi1> to vector<8x128xi32>
    %9 = arith.sitofp %8 : vector<8x128xi32> to vector<8x128xf32>
    %10 = arith.truncf %9 : vector<8x128xf32> to vector<8x128xbf16>
    %c0_3 = arith.constant 0 : index
    %c0_4 = arith.constant 0 : index
    %c0_5 = arith.constant 0 : index
    %11 = vector.load %arg2[%c0_3, %c0_4, %c0_5] : memref<3x128x128xbf16, #tpu.memory_space<vmem>>, vector<1x128x128xbf16>
    %12 = vector.shape_cast %11 : vector<1x128x128xbf16> to vector<128x128xbf16>
    %cst = arith.constant dense<0.000000e+00> : vector<8x128xf32>
    %13 = tpu.matmul %10, %12, %cst {dimension_numbers = #tpu.dot_dimension_numbers<[1], [0], [0], [1], [0, 0, 1, 1], [], []>} : vector<8x128xbf16>, vector<128x128xbf16>, vector<8x128xf32> -> vector<8x128xf32>
    %14 = arith.addf %3, %13 : vector<8x128xf32>
    %15 = vector.extract_strided_slice %0 {offsets = [0, 1], sizes = [8, 1], strides = [1, 1]} : vector<8x3xi32> to vector<8x1xi32>
    %16 = vector.broadcast %15 : vector<8x1xi32> to vector<8x128xi32>
    %17 = arith.cmpi eq, %4, %16 : vector<8x128xi32>
    %18 = arith.extui %17 : vector<8x128xi1> to vector<8x128xi32>
    %19 = arith.sitofp %18 : vector<8x128xi32> to vector<8x128xf32>
    %20 = arith.truncf %19 : vector<8x128xf32> to vector<8x128xbf16>
    %c1 = arith.constant 1 : index
    %c0_6 = arith.constant 0 : index
    %c0_7 = arith.constant 0 : index
    %21 = vector.load %arg2[%c1, %c0_6, %c0_7] : memref<3x128x128xbf16, #tpu.memory_space<vmem>>, vector<1x128x128xbf16>
    %22 = vector.shape_cast %21 : vector<1x128x128xbf16> to vector<128x128xbf16>
    %cst_8 = arith.constant dense<0.000000e+00> : vector<8x128xf32>
    %23 = tpu.matmul %20, %22, %cst_8 {dimension_numbers = #tpu.dot_dimension_numbers<[1], [0], [0], [1], [0, 0, 1, 1], [], []>} : vector<8x128xbf16>, vector<128x128xbf16>, vector<8x128xf32> -> vector<8x128xf32>
    %24 = arith.addf %14, %23 : vector<8x128xf32>
    %25 = vector.extract_strided_slice %0 {offsets = [0, 2], sizes = [8, 1], strides = [1, 1]} : vector<8x3xi32> to vector<8x1xi32>
    %26 = vector.broadcast %25 : vector<8x1xi32> to vector<8x128xi32>
    %27 = arith.cmpi eq, %4, %26 : vector<8x128xi32>
    %28 = arith.extui %27 : vector<8x128xi1> to vector<8x128xi32>
    %29 = arith.sitofp %28 : vector<8x128xi32> to vector<8x128xf32>
    %30 = arith.truncf %29 : vector<8x128xf32> to vector<8x128xbf16>
    %c2 = arith.constant 2 : index
    %c0_9 = arith.constant 0 : index
    %c0_10 = arith.constant 0 : index
    %31 = vector.load %arg2[%c2, %c0_9, %c0_10] : memref<3x128x128xbf16, #tpu.memory_space<vmem>>, vector<1x128x128xbf16>
    %32 = vector.shape_cast %31 : vector<1x128x128xbf16> to vector<128x128xbf16>
    %cst_11 = arith.constant dense<0.000000e+00> : vector<8x128xf32>
    %33 = tpu.matmul %30, %32, %cst_11 {dimension_numbers = #tpu.dot_dimension_numbers<[1], [0], [0], [1], [0, 0, 1, 1], [], []>} : vector<8x128xbf16>, vector<128x128xbf16>, vector<8x128xf32> -> vector<8x128xf32>
    %34 = arith.addf %24, %33 : vector<8x128xf32>
    %cst_12 = arith.constant 0.000000e+00 : f32
    %35 = vector.broadcast %cst_12 : f32 to vector<8x128xf32>
    %36 = arith.maximumf %34, %35 : vector<8x128xf32>
    %37 = arith.truncf %36 : vector<8x128xf32> to vector<8x128xbf16>
    %c0_13 = arith.constant 0 : index
    %c0_14 = arith.constant 0 : index
    %38 = vector.load %arg4[%c0_13, %c0_14] : memref<128x128xbf16, #tpu.memory_space<vmem>>, vector<128x128xbf16>
    %cst_15 = arith.constant dense<0.000000e+00> : vector<8x128xf32>
    %39 = tpu.matmul %37, %38, %cst_15 {dimension_numbers = #tpu.dot_dimension_numbers<[1], [0], [0], [1], [0, 0, 1, 1], [], []>} : vector<8x128xbf16>, vector<128x128xbf16>, vector<8x128xf32> -> vector<8x128xf32>
    %c0_16 = arith.constant 0 : index
    %c0_17 = arith.constant 0 : index
    %40 = vector.load %arg5[%c0_16, %c0_17] : memref<1x128xf32, #tpu.memory_space<vmem>>, vector<1x128xf32>
    %41 = vector.broadcast %40 : vector<1x128xf32> to vector<8x128xf32>
    %42 = arith.addf %39, %41 : vector<8x128xf32>
    %cst_18 = arith.constant dense<0xFF800000> : vector<8xf32>
    %43 = vector.multi_reduction <maximumf>, %42, %cst_18 [1] : vector<8x128xf32> to vector<8xf32>
    %44 = vector.shape_cast %43 : vector<8xf32> to vector<8x1xf32>
    %45 = vector.broadcast %44 : vector<8x1xf32> to vector<8x128xf32>
    %46 = arith.subf %42, %45 : vector<8x128xf32>
    %47 = math.exp %46 : vector<8x128xf32>
    %cst_19 = arith.constant dense<0.000000e+00> : vector<8xf32>
    %48 = vector.multi_reduction <add>, %47, %cst_19 [1] : vector<8x128xf32> to vector<8xf32>
    %49 = vector.shape_cast %48 : vector<8xf32> to vector<8x1xf32>
    %50 = math.log %49 : vector<8x1xf32>
    %51 = vector.broadcast %50 : vector<8x1xf32> to vector<8x128xf32>
    %52 = arith.subf %46, %51 : vector<8x128xf32>
    %c0_20 = arith.constant 0 : index
    %c0_21 = arith.constant 0 : index
    %53 = vector.load %arg6[%c0_20, %c0_21] : memref<8x128xf32, #tpu.memory_space<vmem>>, vector<8x128xf32>
    tpu.vector_store %arg6[%c0_20, %c0_21], %52 {strides = array<i32>} : memref<8x128xf32, #tpu.memory_space<vmem>>, vector<8x128xf32>,
    return
  }
  func.func @transform_0(%arg0: i32) -> (i32, i32) {
    %c0_i32 = arith.constant 0 : i32
    %c0_i32_0 = arith.constant 0 : i32
    return %arg0, %c0_i32 : i32, i32
  }
  func.func @transform_1(%arg0: i32) -> (i32, i32, i32) {
    %c0_i32 = arith.constant 0 : i32
    %c0_i32_0 = arith.constant 0 : i32
    %c0_i32_1 = arith.constant 0 : i32
    %c0_i32_2 = arith.constant 0 : i32
    return %c0_i32, %c0_i32_0, %c0_i32_1 : i32, i32, i32
  }
  func.func @transform_2(%arg0: i32) -> (i32, i32) {
    %c0_i32 = arith.constant 0 : i32
    %c0_i32_0 = arith.constant 0 : i32
    %c0_i32_1 = arith.constant 0 : i32
    return %c0_i32, %c0_i32_0 : i32, i32
  }
  func.func @transform_3(%arg0: i32) -> (i32, i32) {
    %c0_i32 = arith.constant 0 : i32
    %c0_i32_0 = arith.constant 0 : i32
    %c0_i32_1 = arith.constant 0 : i32
    return %c0_i32, %c0_i32_0 : i32, i32
  }
  func.func @transform_4(%arg0: i32) -> (i32, i32) {
    %c0_i32 = arith.constant 0 : i32
    %c0_i32_0 = arith.constant 0 : i32
    %c0_i32_1 = arith.constant 0 : i32
    return %c0_i32, %c0_i32_0 : i32, i32
  }
  func.func @transform_5(%arg0: i32) -> (i32, i32) {
    %c0_i32 = arith.constant 0 : i32
    %c0_i32_0 = arith.constant 0 : i32
    return %arg0, %c0_i32 : i32, i32
  }
}

</mosaic_0001>

<bundles_post_ra>
// kernel: ffnn_lm_forward.1
= control target key start
LH: loop header
LB: loop body
LE: loop exit
PB: predicated region body
PF: predicated region fallthrough
CT: control target
= control target key end

     0   :  { %v768_v2 = vmov 0   ;;  %v769_v3 = vmov 2   ;;  %v770_v4 = vmov 0.0   ;;  %vm771_vm0 = vmmov 0   ;;  %s953_s0 = inlined_call_operand.vmem [shape: s32[8,3], index: 0, kind: input, shape index: {}]   ;;  %s954_s1 = inlined_call_operand.vmem [shape: bf16[3,128,128], index: 1, kind: input, shape index: {}]   ;;  %s955_s2 = inlined_call_operand.vmem [shape: f32[1,128], index: 2, kind: input, shape index: {}]   ;;  %s956_s3 = inlined_call_operand.vmem [shape: bf16[128,128], index: 3, kind: input, shape index: {}]   ;;  %s957_s4 = inlined_call_operand.vmem [shape: f32[1,128], index: 4, kind: input, shape index: {}]   ;;  %s958_s5 = inlined_call_operand.hbm [shape: f32[8,128], index: 5, kind: output, shape index: {}]  }
   0x1   :  { %v22_v0 = vld [vmem:[%s953_s0] sm:$0xff]  ;;  %v710_v1 = vld [vmem:[%s954_s1 + $0x38] sm:$0xff]   ;;  %706 = vset.pattern.permute.xlu0 %v768_v2  ;;  %708 = vset.pattern.permute.xlu1 %v769_v3  ;;  %v711_v6 = vld [vmem:[%s954_s1 + $0x30] sm:$0xff]   ;;  %v772_v8 = vmov 1  }
   0x2   :  { %33 = vperm.xlu0 %706, %v22_v0   ;;  %258 = vperm.xlu1 %708, %v22_v0   ;;  %v712_v5 = vld [vmem:[%s954_s1 + $0x78] sm:$0xff]   ;;  %v714_v7 = vld [vmem:[%s954_s1 + $0x70] sm:$0xff]   ;;  %v713_v9 = vld [vmem:[%s954_s1 + $0x28] sm:$0xff]  }
   0x3   :  { %619 = vmatprep.subr.bf16.mxu0 %v770_v4  ;;  %639 = vmatprep.subr.bf16.mxu1 %v770_v4  ;;  %v716_v10 = vld [vmem:[%s954_s1 + $0x68] sm:$0xff]   ;;  %v715_v11 = vld [vmem:[%s954_s1 + $0x20] sm:$0xff]   ;;  %v717_v13 = vld [vmem:[%s954_s1 + $0x18] sm:$0xff]  }
   0x4   :  { %620 = vmatpush3.bf16.msra.mxu0 %v710_v1  ;;  %635 = vmatprep.mubr.msk.bf16.mxu0 %vm771_vm0, %v770_v4  ;;  %v718_v12 = vld [vmem:[%s954_s1 + $0x60] sm:$0xff]   ;;  %v720_v14 = vld [vmem:[%s954_s1 + $0x58] sm:$0xff]   ;;  %v719_v15 = vld [vmem:[%s954_s1 + $0x10] sm:$0xff]  }
   0x5   :  { %621 = vmatprep.subr.bf16.mxu0 %v770_v4  ;;  %640 = vmatpush3.bf16.msra.mxu1 %v712_v5  ;;  %v722_v16 = vld [vmem:[%s954_s1 + $0x50] sm:$0xff]   ;;  %v721_v17 = vld [vmem:[%s954_s1 + $0x8] sm:$0xff]   ;;  %v723_v19 = vld [vmem:[%s954_s1] sm:$0xff]  }
   0x6   :  { %707 = vset.pattern.permute.xlu0 %v772_v8  ;;  %641 = vmatprep.subr.bf16.mxu1 %v770_v4  ;;  %v724_v18 = vld [vmem:[%s954_s1 + $0x48] sm:$0xff]   ;;  %v726_v20 = vld [vmem:[%s954_s1 + $0x40] sm:$0xff]  }
   0x7   :  { %145 = vperm.xlu0 %707, %v22_v0   ;;  %655 = vmatprep.mubr.msk.bf16.mxu1 %vm771_vm0, %v770_v4 }
   0x8   :  { %622 = vmatpush3.bf16.msra.mxu0 %v711_v6 }
   0x9   :  { %623 = vmatprep.subr.bf16.mxu0 %v770_v4  ;;  %642 = vmatpush3.bf16.msra.mxu1 %v714_v7 }
   0xa   :  { %643 = vmatprep.subr.bf16.mxu1 %v770_v4 }
   0xb   :  { %709 = vset.pattern.permute.xlu0 %v769_v3 }
   0xc   :  { %624 = vmatpush3.bf16.msra.mxu0 %v713_v9 }
   0xd   :  { %625 = vmatprep.subr.bf16.mxu0 %v770_v4  ;;  %644 = vmatpush3.bf16.msra.mxu1 %v716_v10 }
   0xe   :  { %645 = vmatprep.subr.bf16.mxu1 %v770_v4 }
  0x10   :  { %626 = vmatpush3.bf16.msra.mxu0 %v715_v11 }
  0x11   :  { %627 = vmatprep.subr.bf16.mxu0 %v770_v4  ;;  %646 = vmatpush3.bf16.msra.mxu1 %v718_v12 }
  0x12   :  { %647 = vmatprep.subr.bf16.mxu1 %v770_v4 }
  0x14   :  { %628 = vmatpush3.bf16.msra.mxu0 %v717_v13 }
  0x15   :  { %629 = vmatprep.subr.bf16.mxu0 %v770_v4  ;;  %648 = vmatpush3.bf16.msra.mxu1 %v720_v14 }
  0x16   :  { %649 = vmatprep.subr.bf16.mxu1 %v770_v4 }
  0x18   :  { %630 = vmatpush3.bf16.msra.mxu0 %v719_v15 }
  0x19   :  { %631 = vmatprep.subr.bf16.mxu0 %v770_v4  ;;  %650 = vmatpush3.bf16.msra.mxu1 %v722_v16 }
  0x1a   :  { %651 = vmatprep.subr.bf16.mxu1 %v770_v4 }
  0x1c   :  { %632 = vmatpush3.bf16.msra.mxu0 %v721_v17 }
  0x1d   :  { %633 = vmatprep.subr.bf16.mxu0 %v770_v4  ;;  %652 = vmatpush3.bf16.msra.mxu1 %v724_v18 }
  0x1e   :  { %653 = vmatprep.subr.bf16.mxu1 %v770_v4 }
  0x1f   :  { %10 = vsyncpa [#allocation3], 0  ;;  %v30_v21 = vlaneseq  ;;  %v725_v24 = vld [vmem:[%s954_s1 + $0xb8] sm:$0xff]   ;;  %v773_v25 = vmov 1.0|1.0   ;;  %v727_v26 = vld [vmem:[%s954_s1 + $0xb0] sm:$0xff]  }
  0x20   :  { %634 = vmatpush3.bf16.msra.mxu0 %v723_v19  ;;  %v728_v28 = vld [vmem:[%s954_s1 + $0xa8] sm:$0xff]   ;;  %v729_v29 = vld [vmem:[%s954_s1 + $0xa0] sm:$0xff]   ;;  %v730_v30 = vld [vmem:[%s954_s1 + $0x98] sm:$0xff]  }
  0x21   :  { %659 = vmatprep.subr.bf16.mxu0 %v770_v4  ;;  %654 = vmatpush3.bf16.msra.mxu1 %v726_v20  ;;  %v31_v22 = vand.u32 127, %v30_v21  ;;  %v731_v31 = vld [vmem:[%s954_s1 + $0x90] sm:$0xff]   ;;  %v732_v32 = vld [vmem:[%s954_s1 + $0x88] sm:$0xff]   ;;  %v733_v34 = vld [vmem:[%s954_s1 + $0x80] sm:$0xff]  }
  0x22   :  { %679 = vmatprep.subr.bf16.mxu1 %v770_v4  ;;  %v734_v35 = vld [vmem:[%s956_s3 + $0x38] sm:$0xff]   ;;  %v735_v36 = vld [vmem:[%s956_s3 + $0x30] sm:$0xff]   ;;  %v736_v37 = vld [vmem:[%s956_s3 + $0x28] sm:$0xff]  }
  0x23   :  { %v737_v38 = vld [vmem:[%s956_s3 + $0x20] sm:$0xff]   ;;  %v738_v39 = vld [vmem:[%s956_s3 + $0x18] sm:$0xff]   ;;  %v739_v40 = vld [vmem:[%s956_s3 + $0x10] sm:$0xff]  }
  0x24   :  { %v740_v41 = vld [vmem:[%s956_s3 + $0x8] sm:$0xff]   ;;  %v741_v42 = vld [vmem:[%s956_s3] sm:$0xff]  }
  0x25   :  { %v508_v51 = vld [vmem:[%s955_s2] ss:$0 sm:$0xff]  ;;  %s774_s2 = smov [#allocation2]  }
  0x26   :  { %v574_v61 = vld [vmem:[%s957_s4] ss:$0 sm:$0xff]  ;;  %s500_s8 = sshll.u32 %s774_s2, 4  ;;  %s501_s8 = int_to_ptr.vmem [resolvable:$true] %s500_s8 }
  0x27   :  { %s746_s4 = scalar_lea.vmem %s501_s8, 128  ;;  %p751_p1 = scmp.lt.s32.totalorder %s501_s8, %s501_s8 }
  0x28   :  { %p747_p0 = scmp.ne.s32.totalorder %s501_s8, %s746_s4  ;;  %p752_p2 = scmp.lt.s32.totalorder %s746_s4, %s746_s4 }
  0x2a   :  { %p753_p3 = por %p752_p2, %p751_p1 }
  0x2c   :  { %p754_p4 = pnand %p753_p3, %p747_p0 }
  0x7d   :  { %v34_v23 = vpop.permute.xlu0 %33  ;;  %v259_v33 = vpop.permute.xlu1 %258 }
  0x7e   :  { %vm35_vm1 = vcmp.eq.s32.totalorder %v31_v22, %v34_v23  ;;  %vm260_vm5 = vcmp.eq.s32.totalorder %v31_v22, %v259_v33 }
  0x7f   :  { %vm518_vm2 = vmpackc.low %vm35_vm1, %vm35_vm1 }
  0x80   :  { %636 = vmatmul.mubr.msk.bf16.vlgmr.msra.gmra.mxu0 %vm518_vm2, %v773_v25  ;;  %vm572_vm6 = vmpackc.low %vm260_vm5, %vm260_vm5 }
  0x81   :  { %660 = vmatpush3.bf16.msra.mxu0 %v725_v24  ;;  %675 = vmatprep.mubr.msk.bf16.mxu0 %vm771_vm0, %v770_v4 }
  0x82   :  { %v146_v27 = vpop.permute.xlu0 %145  ;;  %661 = vmatprep.subr.bf16.mxu0 %v770_v4 }
  0x83   :  { %vm147_vm3 = vcmp.eq.s32.totalorder %v31_v22, %v146_v27 }
  0x84   :  { %vm545_vm4 = vmpackc.low %vm147_vm3, %vm147_vm3 }
  0x85   :  { %662 = vmatpush3.bf16.msra.mxu0 %v727_v26  ;;  %656 = vmatmul.mubr.msk.bf16.vlgmr.msra.gmra.mxu1 %vm545_vm4, %v773_v25 }
  0x86   :  { %663 = vmatprep.subr.bf16.mxu0 %v770_v4  ;;  %695 = vmatprep.mubr.msk.bf16.mxu1 %vm771_vm0, %v770_v4 }
  0x87   :  { %680 = vmatpush3.bf16.msra.mxu1 %v734_v35 }
  0x88   :  { %681 = vmatprep.subr.bf16.mxu1 %v770_v4 }
  0x89   :  { %664 = vmatpush3.bf16.msra.mxu0 %v728_v28 }
  0x8a   :  { %665 = vmatprep.subr.bf16.mxu0 %v770_v4 }
  0x8b   :  { %682 = vmatpush3.bf16.msra.mxu1 %v735_v36 }
  0x8c   :  { %683 = vmatprep.subr.bf16.mxu1 %v770_v4 }
  0x8d   :  { %666 = vmatpush3.bf16.msra.mxu0 %v729_v29 }
  0x8e   :  { %667 = vmatprep.subr.bf16.mxu0 %v770_v4 }
  0x8f   :  { %684 = vmatpush3.bf16.msra.mxu1 %v736_v37 }
  0x90   :  { %685 = vmatprep.subr.bf16.mxu1 %v770_v4 }
  0x91   :  { %668 = vmatpush3.bf16.msra.mxu0 %v730_v30 }
  0x92   :  { %669 = vmatprep.subr.bf16.mxu0 %v770_v4 }
  0x93   :  { %686 = vmatpush3.bf16.msra.mxu1 %v737_v38 }
  0x94   :  { %687 = vmatprep.subr.bf16.mxu1 %v770_v4 }
  0x95   :  { %670 = vmatpush3.bf16.msra.mxu0 %v731_v31 }
  0x96   :  { %671 = vmatprep.subr.bf16.mxu0 %v770_v4 }
  0x97   :  { %688 = vmatpush3.bf16.msra.mxu1 %v738_v39 }
  0x98   :  { %689 = vmatprep.subr.bf16.mxu1 %v770_v4 }
  0x99   :  { %672 = vmatpush3.bf16.msra.mxu0 %v732_v32 }
  0x9a   :  { %673 = vmatprep.subr.bf16.mxu0 %v770_v4 }
  0x9b   :  { %690 = vmatpush3.bf16.msra.mxu1 %v739_v40 }
  0x9c   :  { %691 = vmatprep.subr.bf16.mxu1 %v770_v4 }
  0x9d   :  { %674 = vmatpush3.bf16.msra.mxu0 %v733_v34 }
  0x9f   :  { %692 = vmatpush3.bf16.msra.mxu1 %v740_v41 }
  0xa0   :  { %676 = vmatmul.mubr.msk.bf16.vlgmr.msra.gmra.mxu0 %vm572_vm6, %v773_v25  ;;  %693 = vmatprep.subr.bf16.mxu1 %v770_v4 }
  0xa3   :  { %694 = vmatpush3.bf16.msra.mxu1 %v741_v42 }
 0x140   :  { %v137_v43 = vpop.f32.mrf.mxu0 }
 0x141   :  { %v143_v52 = vadd.f32 %v508_v51, %v137_v43 }
 0x142   :  { %v637_v44 = vpop.f32.mrf.mxu0 }
 0x144   :  { %v140_v45 = vpop.f32.mrf.mxu0 }
 0x145   :  { %v250_v46 = vpop.f32.mrf.mxu1 }
 0x146   :  { %v638_v47 = vpop.f32.mrf.mxu0  ;;  %v256_v53 = vadd.f32 %v250_v46, %v143_v52 }
 0x147   :  { %v657_v48 = vpop.f32.mrf.mxu1 }
 0x149   :  { %v253_v49 = vpop.f32.mrf.mxu1 }
 0x14b   :  { %v658_v50 = vpop.f32.mrf.mxu1 }
 0x160   :  { %v363_v54 = vpop.f32.mrf.mxu0 }
 0x161   :  { %v369_v55 = vadd.f32 %v363_v54, %v256_v53 }
 0x162   :  { %v677_v56 = vpop.f32.mrf.mxu0 }
 0x163   :  { %v370_v57 = vmax.f32 %v369_v55, 0.0 }
 0x164   :  { %v366_v58 = vpop.f32.mrf.mxu0 }
 0x165   :  { %v371_v59 = vpack.c.bf16 %v370_v57, %v370_v57 }
 0x166   :  { %v678_v60 = vpop.f32.mrf.mxu0 }
 0x167   :  { %696 = vmatmul.mubr.bf16.vlgmr.msra.gmra.mxu1 %v371_v59 }
 0x227   :  { %v477_v62 = vpop.f32.mrf.mxu1 }
 0x228   :  { %v478_v63 = vadd.f32 %v574_v61, %v477_v62 }
 0x229   :  { %v697_v0 = vpop.f32.mrf.mxu1 }
 0x22a   :  { %483 = vmax.xlane.f32.xlu1 %v478_v63 }
 0x22b   :  { %v480_v1 = vpop.f32.mrf.mxu1 }
 0x22d   :  { %v698_v2 = vpop.f32.mrf.mxu1 }
 0x2b3   :  { %v484_v3 = vpop.xlane.xlu1 %483 }
 0x2b4   :  { %v485_v4 = vsub.f32 %v478_v63, %v484_v3 }
 0x2b6   :  { %v486_v5 = vmul.f32 1.442695, %v485_v4 }
 0x2b8   :  { %742 = vpow2.f32 %v486_v5 }
 0x2c5   :  { %v743_v6 = vpop.eup %742 }
 0x2c6   :  { %488 = vadd.xlane.f32.xlu0 %v743_v6 }
 0x34f   :  { %v489_v7 = vpop.xlane.xlu0 %488 }
 0x350   :  { %744 = vlog2.f32 %v489_v7 }
 0x35d   :  { %v745_v8 = vpop.eup %744 }
 0x35e   :  { %v491_v9 = vmul.f32 0.6931472, %v745_v8 }
 0x360   :  { %v492_v10 = vsub.f32 %v485_v4, %v491_v9 }
 0x362   :  { %493 = vst [vmem:[#allocation2] sm:$0xff] %v492_v10 }
 0x363   :  { %757 = shalt.err (!%p754_p4)
}
 0x364   :  { %503 = dma.vmem_to_hbm [thread:$0]  %s501_s8, 128, %s958_s5, [#allocation3]  }
 0x365   :  { %766 = dma.done.wait [#allocation3], 128  }
 0x366   :  { %767 = vsyncadd [#allocation3], 4294967168 }
 0x367   :  { %507 = vsyncpa [#allocation3], 1 }

</bundles_post_ra>
